<compile_context>
chip_gen: v6e
topology: v6e:2x2x1
jax: 0.10.0
libtpu: 0.0.40
codegen_flags: <defaults>
</compile_context>

<pallas_src>
import jax
import jax.numpy as jnp
from jax.experimental import pallas as pl
from jax.experimental.pallas import tpu as pltpu


# ---------------------------------------------------------------------------
# Kernels
# ---------------------------------------------------------------------------
def _addmm_kernel_f32_out(y_ref, z_ref, x_ref, o_ref):
    """f32 output: accumulate directly into the (k-resident) output block."""
    k = pl.program_id(2)

    @pl.when(k == 0)
    def _():
        o_ref[...] = jnp.zeros_like(o_ref)

    o_ref[...] += jnp.dot(
        y_ref[...], z_ref[...], preferred_element_type=jnp.float32
    )

    @pl.when(k == pl.num_programs(2) - 1)
    def _():
        # x_ref is (1, tn) or (tm, tn); broadcasting handles both.
        o_ref[...] += x_ref[...].astype(jnp.float32)


def _addmm_kernel_acc(y_ref, z_ref, x_ref, o_ref, acc_ref):
    """Narrow output dtype: accumulate in f32 scratch, downcast in epilogue."""
    k = pl.program_id(2)

    @pl.when(k == 0)
    def _():
        acc_ref[...] = jnp.zeros_like(acc_ref)

    acc_ref[...] += jnp.dot(
        y_ref[...], z_ref[...], preferred_element_type=jnp.float32
    )

    @pl.when(k == pl.num_programs(2) - 1)
    def _():
        o_ref[...] = (acc_ref[...] + x_ref[...].astype(jnp.float32)).astype(
            o_ref.dtype
        )


# ---------------------------------------------------------------------------
# Tiling / VMEM helpers
# ---------------------------------------------------------------------------
def _round_up(x, m):
    return (x + m - 1) // m * m


def _pick_tile(dim, target, align):
    """Return (tile, padded_dim).

    tile divides padded_dim, padding is < align elements, and the tile is
    either `align`-aligned or equal to padded_dim (legal either way).
    """
    if dim <= target:
        p = _round_up(dim, align)
        return p, p
    p = _round_up(dim, align)
    t = max((target // align) * align, align)
    while t >= align:
        if p % t == 0:
            return t, p
        t -= align
    return align, p


def _vmem_capacity_bytes():
    try:
        return int(pltpu.get_tpu_info().vmem_capacity_bytes)
    except Exception:
        return 128 * 1024 * 1024  # v5e / v6e default


def _vmem_need_bytes(tm, tn, tk, y_dt, z_dt, o_dt, bias_dt, bias_rows, needs_acc):
    isz = lambda dt: jnp.dtype(dt).itemsize
    bias_tile = (tm if bias_rows > 1 else 1) * tn
    need = (
        2 * tm * tk * isz(y_dt)          # y (double buffered)
        + 2 * tk * tn * isz(z_dt)        # z
        + 2 * tm * tn * isz(o_dt)        # output
        + 2 * bias_tile * isz(bias_dt)   # bias
    )
    if needs_acc:
        need += tm * tn * 4              # f32 accumulator scratch
    return need


def _halve(tile, padded_dim, align):
    h = tile // 2
    if h >= align and h % align == 0 and padded_dim % h == 0:
        return h
    return tile


# ---------------------------------------------------------------------------
# Wrapper
# ---------------------------------------------------------------------------
def addmm(x, y, z, *, tm=512, tn=1024, tk=2048, cast_inputs_to_bf16=False):
    """aten.addmm(x, y, z) == x + y @ z, with x broadcastable to (M, N)."""
    y = jnp.asarray(y)
    z = jnp.asarray(z)
    M, K = y.shape
    K2, N = z.shape
    assert K == K2, "inner dims must match"

    # TODO(synk): integer addmm (torch integer accumulation semantics) is not
    # implemented; v7x has no integer MXU mode, so reject instead of faking it.
    assert jnp.issubdtype(y.dtype, jnp.floating) and jnp.issubdtype(
        z.dtype, jnp.floating
    ), "only floating-point inputs are supported"

    # --- normalize bias to 2-D without materializing (M, N) ----------------
    x2 = jnp.asarray(x)
    if x2.ndim == 0:
        x2 = x2.reshape(1, 1)
    elif x2.ndim == 1:
        x2 = x2.reshape(1, x2.shape[0])
    assert x2.ndim == 2, "bias must be at most 2-D"
    if x2.shape[1] == 1 and N > 1:
        x2 = jnp.broadcast_to(x2, (x2.shape[0], N))
    assert x2.shape[1] == N, "bias last dim must broadcast to N"
    bias_rows = x2.shape[0]
    assert bias_rows in (1, M), "bias first dim must broadcast to M"

    out_dtype = jnp.result_type(x2.dtype, y.dtype, z.dtype)

    # Optional precision knob: v6e/v7x MXU is bf16-native; accumulation stays f32.
    if cast_inputs_to_bf16 and y.dtype == jnp.float32:
        y = y.astype(jnp.bfloat16)
    if cast_inputs_to_bf16 and z.dtype == jnp.float32:
        z = z.astype(jnp.bfloat16)

    # --- tile selection + padding ------------------------------------------
    tm, Mp = _pick_tile(M, tm, 8)
    tn, Np = _pick_tile(N, tn, 128)
    tk, Kp = _pick_tile(K, tk, 128)

    # Megacore / v7x: make sure the parallel (i, j) axes have >= 2 blocks so
    # both TensorCores get work (harmless on single-TC chips).
    if (Mp // tm) * (Np // tn) == 1:
        if tn % 256 == 0 and tn // 2 >= 256:
            tn //= 2
        elif tm % 16 == 0 and tm // 2 >= 128:
            tm //= 2

    needs_acc = out_dtype != jnp.float32

    # --- generation-aware VMEM budget ---------------------------------------
    vmem_cap = _vmem_capacity_bytes()
    vmem_budget = vmem_cap - max(vmem_cap // 8, 8 * 1024 * 1024)  # headroom

    def need():
        return _vmem_need_bytes(
            tm, tn, tk, y.dtype, z.dtype, out_dtype, x2.dtype, bias_rows, needs_acc
        )

    # Shrink tk first (cheapest), then tn, then tm if the tiles would not fit.
    while need() > vmem_budget:
        new_tk = _halve(tk, Kp, 128)
        if new_tk != tk:
            tk = new_tk
            continue
        new_tn = _halve(tn, Np, 128)
        if new_tn != tn:
            tn = new_tn
            continue
        new_tm = _halve(tm, Mp, 8)
        if new_tm != tm:
            tm = new_tm
            continue
        break

    vmem_limit = int(min(max(need() * 3 // 2, 32 * 1024 * 1024), vmem_budget))

    # --- zero-pad operands (zeros add nothing; padded rows/cols sliced away) -
    if (Mp, Kp) != (M, K):
        y = jnp.pad(y, ((0, Mp - M), (0, Kp - K)))
    if (Kp, Np) != (K, N):
        z = jnp.pad(z, ((0, Kp - K), (0, Np - N)))
    pad_bias_rows = (Mp - M) if bias_rows > 1 else 0
    if pad_bias_rows or Np != N:
        x2 = jnp.pad(x2, ((0, pad_bias_rows), (0, Np - N)))

    grid = (Mp // tm, Np // tn, Kp // tk)

    # Bias last in in_specs: its tiny DMA never competes with y/z prefetch.
    if bias_rows == 1:
        bias_spec = pl.BlockSpec((1, tn), lambda i, j, k: (0, j))
    else:
        bias_spec = pl.BlockSpec((tm, tn), lambda i, j, k: (i, j))

    kernel = _addmm_kernel_acc if needs_acc else _addmm_kernel_f32_out
    scratch = [pltpu.VMEM((tm, tn), jnp.float32)] if needs_acc else []

    out = pl.pallas_call(
        kernel,
        out_shape=jax.ShapeDtypeStruct((Mp, Np), out_dtype),
        grid_spec=pltpu.PrefetchScalarGridSpec(
            num_scalar_prefetch=0,
            grid=grid,
            in_specs=[
                pl.BlockSpec((tm, tk), lambda i, j, k: (i, k)),  # y
                pl.BlockSpec((tk, tn), lambda i, j, k: (k, j)),  # z
                bias_spec,                                       # bias x
            ],
            out_specs=pl.BlockSpec((tm, tn), lambda i, j, k: (i, j)),
            scratch_shapes=scratch,
        ),
        compiler_params=pltpu.CompilerParams(
            dimension_semantics=("parallel", "parallel", "arbitrary"),
            vmem_limit_bytes=vmem_limit,
        ),
    )(y, z, x2)

    if (Mp, Np) != (M, N):
        out = out[:M, :N]
    return out


if __name__ == "__main__":
    key = jax.random.PRNGKey(0)
    kx, ky, kz, kb, kr = jax.random.split(key, 5)

    # --- standard divisible case, 1-D bias ----------------------------------
    M, K, N = 128, 256, 128
    y = jax.random.normal(ky, (M, K), dtype=jnp.float32)
    z = jax.random.normal(kz, (K, N), dtype=jnp.float32)
    x_vec = jax.random.normal(kx, (N,), dtype=jnp.float32)

    out_vec = addmm(x_vec, y, z)
    jax.block_until_ready(out_vec)
    ref_vec = x_vec + y @ z
    assert out_vec.shape == (M, N)
    assert jnp.allclose(out_vec, ref_vec, atol=1e-3, rtol=1e-3)

    # --- full (M, N) bias path ----------------------------------------------
    x_full = jax.random.normal(kb, (M, N), dtype=jnp.float32)
    out_full = addmm(x_full, y, z)
    jax.block_until_ready(out_full)
    ref_full = x_full + y @ z
    assert out_full.shape == (M, N)
    assert jnp.allclose(out_full, ref_full, atol=1e-3, rtol=1e-3)

    # --- non-divisible shapes (exercises the pad + slice path) ---------------
    Mr, Kr, Nr = 100, 200, 136
    k1, k2, k3 = jax.random.split(kr, 3)
    yr = jax.random.normal(k1, (Mr, Kr), dtype=jnp.float32)
    zr = jax.random.normal(k2, (Kr, Nr), dtype=jnp.float32)
    xr = jax.random.normal(k3, (Nr,), dtype=jnp.float32)
    out_r = addmm(xr, yr, zr)
    jax.block_until_ready(out_r)
    ref_r = xr + yr @ zr
    assert out_r.shape == (Mr, Nr)
    assert jnp.allclose(out_r, ref_r, atol=1e-3, rtol=1e-3)

    # --- bf16 inputs (exercises the f32-scratch epilogue path) ---------------
    y_bf = y.astype(jnp.bfloat16)
    z_bf = z.astype(jnp.bfloat16)
    x_bf = x_vec.astype(jnp.bfloat16)
    out_bf = addmm(x_bf, y_bf, z_bf)
    jax.block_until_ready(out_bf)
    assert out_bf.dtype == jnp.bfloat16 and out_bf.shape == (M, N)
    ref_bf = x_bf.astype(jnp.float32) + y_bf.astype(jnp.float32) @ z_bf.astype(
        jnp.float32
    )
    assert jnp.allclose(out_bf.astype(jnp.float32), ref_bf, atol=5e-1, rtol=5e-2)

    print("KERNEL_OK")
</pallas_src>

<mosaic_0001>
module attributes {stable_mosaic.version = 11 : i64} {
  func.func @_addmm_kernel_f32_out(%arg0: i32, %arg1: i32, %arg2: i32, %arg3: memref<128x256xf32, #tpu.memory_space<vmem>>, %arg4: memref<256x128xf32, #tpu.memory_space<vmem>>, %arg5: memref<1x128xf32, #tpu.memory_space<vmem>>, %arg6: memref<128x128xf32, #tpu.memory_space<vmem>>) attributes {dimension_semantics = [#tpu.dimension_semantics<parallel>, #tpu.dimension_semantics<parallel>, #tpu.dimension_semantics<arbitrary>], iteration_bounds = array<i64: 1, 1, 1>, scalar_prefetch = 0 : i64, scratch_operands = 0 : i64, tpu.core_type = #tpu.core_type<tc>, window_params = [{transform_indices = @transform_0, window_bounds = array<i64: 128, 256>}, {transform_indices = @transform_1, window_bounds = array<i64: 256, 128>}, {transform_indices = @transform_2, window_bounds = array<i64: 1, 128>}, {transform_indices = @transform_3, window_bounds = array<i64: 128, 128>}]} {
    %c0_i32 = arith.constant 0 : i32
    %0 = arith.cmpi eq, %arg2, %c0_i32 : i32
    %1 = arith.extui %0 : i1 to i32
    %c0_i32_0 = arith.constant 0 : i32
    %2 = arith.cmpi ne, %1, %c0_i32_0 : i32
    scf.if %2 {
      %cst_10 = arith.constant 0.000000e+00 : f32
      %12 = vector.broadcast %cst_10 : f32 to vector<128x128xf32>
      %c0_11 = arith.constant 0 : index
      %c0_12 = arith.constant 0 : index
      %13 = vector.load %arg6[%c0_11, %c0_12] : memref<128x128xf32, #tpu.memory_space<vmem>>, vector<128x128xf32>
      tpu.vector_store %arg6[%c0_11, %c0_12], %12 {strides = array<i32>} : memref<128x128xf32, #tpu.memory_space<vmem>>, vector<128x128xf32>,
    } else {
    }
    %c0 = arith.constant 0 : index
    %c0_1 = arith.constant 0 : index
    %3 = vector.load %arg6[%c0, %c0_1] : memref<128x128xf32, #tpu.memory_space<vmem>>, vector<128x128xf32>
    %c0_2 = arith.constant 0 : index
    %c0_3 = arith.constant 0 : index
    %4 = vector.load %arg3[%c0_2, %c0_3] : memref<128x256xf32, #tpu.memory_space<vmem>>, vector<128x256xf32>
    %c0_4 = arith.constant 0 : index
    %c0_5 = arith.constant 0 : index
    %5 = vector.load %arg4[%c0_4, %c0_5] : memref<256x128xf32, #tpu.memory_space<vmem>>, vector<256x128xf32>
    %cst = arith.constant dense<0.000000e+00> : vector<128x128xf32>
    %6 = tpu.matmul %4, %5, %cst {dimension_numbers = #tpu.dot_dimension_numbers<[1], [0], [0], [1], [0, 0, 1, 1], [], []>} : vector<128x256xf32>, vector<256x128xf32>, vector<128x128xf32> -> vector<128x128xf32>
    %7 = arith.addf %3, %6 : vector<128x128xf32>
    %c0_6 = arith.constant 0 : index
    %c0_7 = arith.constant 0 : index
    %8 = vector.load %arg6[%c0_6, %c0_7] : memref<128x128xf32, #tpu.memory_space<vmem>>, vector<128x128xf32>
    tpu.vector_store %arg6[%c0_6, %c0_7], %7 {strides = array<i32>} : memref<128x128xf32, #tpu.memory_space<vmem>>, vector<128x128xf32>,
    %c0_i32_8 = arith.constant 0 : i32
    %9 = arith.cmpi eq, %arg2, %c0_i32_8 : i32
    %10 = arith.extui %9 : i1 to i32
    %c0_i32_9 = arith.constant 0 : i32
    %11 = arith.cmpi ne, %10, %c0_i32_9 : i32
    scf.if %11 {
      %c0_10 = arith.constant 0 : index
      %c0_11 = arith.constant 0 : index
      %12 = vector.load %arg6[%c0_10, %c0_11] : memref<128x128xf32, #tpu.memory_space<vmem>>, vector<128x128xf32>
      %c0_12 = arith.constant 0 : index
      %c0_13 = arith.constant 0 : index
      %13 = vector.load %arg5[%c0_12, %c0_13] : memref<1x128xf32, #tpu.memory_space<vmem>>, vector<1x128xf32>
      %14 = vector.broadcast %13 : vector<1x128xf32> to vector<128x128xf32>
      %15 = arith.addf %12, %14 : vector<128x128xf32>
      %c0_14 = arith.constant 0 : index
      %c0_15 = arith.constant 0 : index
      %16 = vector.load %arg6[%c0_14, %c0_15] : memref<128x128xf32, #tpu.memory_space<vmem>>, vector<128x128xf32>
      tpu.vector_store %arg6[%c0_14, %c0_15], %15 {strides = array<i32>} : memref<128x128xf32, #tpu.memory_space<vmem>>, vector<128x128xf32>,
    } else {
    }
    return
  }
  func.func @transform_0(%arg0: i32, %arg1: i32, %arg2: i32) -> (i32, i32) {
    %c0_i32 = arith.constant 0 : i32
    return %arg0, %arg2 : i32, i32
  }
  func.func @transform_1(%arg0: i32, %arg1: i32, %arg2: i32) -> (i32, i32) {
    %c0_i32 = arith.constant 0 : i32
    return %arg2, %arg1 : i32, i32
  }
  func.func @transform_2(%arg0: i32, %arg1: i32, %arg2: i32) -> (i32, i32) {
    %c0_i32 = arith.constant 0 : i32
    %c0_i32_0 = arith.constant 0 : i32
    return %c0_i32, %arg1 : i32, i32
  }
  func.func @transform_3(%arg0: i32, %arg1: i32, %arg2: i32) -> (i32, i32) {
    %c0_i32 = arith.constant 0 : i32
    return %arg0, %arg1 : i32, i32
  }
}

</mosaic_0001>

<bundles_post_ra>
// kernel: tpu_custom_call.1
= control target key start
LH: loop header
LB: loop body
LE: loop exit
PB: predicated region body
PF: predicated region fallthrough
CT: control target
= control target key end

     0   :  { %8 = vsyncpa [#allocation3], 0  ;;  %s646_s0 = inlined_call_operand.hbm [shape: f32[128,256], index: 0, kind: input, shape index: {}]   ;;  %s647_s1 = inlined_call_operand.hbm [shape: f32[256,128], index: 1, kind: input, shape index: {}]   ;;  %s648_s2 = inlined_call_operand.vmem [shape: f32[1,128], index: 2, kind: input, shape index: {}]   ;;  %s649_s3 = inlined_call_operand.hbm [shape: f32[128,128], index: 3, kind: output, shape index: {}]  }
   0x1   :  { %9 = vsyncpa [#allocation6], 0 }
   0x2   :  { %10 = vsyncpa [#allocation4], 0  ;;  %s583_s12 = smov [#allocation2]  }
   0x3   :  { %s16_s13 = sshll.u32 %s583_s12, 4  ;;  %s17_s13 = int_to_ptr.vmem [resolvable:$true] %s16_s13 }
   0x4   :  { %s525_s14 = scalar_lea.vmem %s17_s13, 4096  ;;  %p530_p1 = scmp.lt.s32.totalorder %s17_s13, %s17_s13 }
   0x5   :  { %p526_p0 = scmp.ne.s32.totalorder %s17_s13, %s525_s14  ;;  %p531_p2 = scmp.lt.s32.totalorder %s525_s14, %s525_s14 }
   0x7   :  { %p532_p3 = por %p531_p2, %p530_p1 }
   0x9   :  { %p533_p4 = pnand %p532_p3, %p526_p0 }
   0xb   :  { %536 = shalt.err (!%p533_p4)
}
   0xc   :  { %s584_s15 = smov 256   ;;  %s585_s16 = smov 16  }
   0xd   :  { %22 = dma.hbm_to_vmem [thread:$0]  %s646_s0, 4096, %s17_s13, [#allocation3], %s584_s15, %s584_s15, %s585_s16  }
   0xe   :  { %s586_s19 = smov [#allocation5]  }
   0xf   :  { %s28_s20 = sshll.u32 %s586_s19, 4  ;;  %s29_s20 = int_to_ptr.vmem [resolvable:$true] %s28_s20 }
  0x10   :  { %s545_s21 = scalar_lea.vmem %s29_s20, 4096  ;;  %p550_p6 = scmp.lt.s32.totalorder %s29_s20, %s29_s20 }
  0x11   :  { %p546_p5 = scmp.ne.s32.totalorder %s29_s20, %s545_s21  ;;  %p551_p7 = scmp.lt.s32.totalorder %s545_s21, %s545_s21 }
  0x13   :  { %p552_p8 = por %p551_p7, %p550_p6 }
  0x15   :  { %p553_p9 = pnand %p552_p8, %p546_p5 }
  0x17   :  { %556 = shalt.err (!%p553_p9)
}
  0x18   :  { %s587_s22 = smov 128   ;;  %s588_s23 = smov 8  }
  0x19   :  { %34 = dma.hbm_to_vmem [thread:$0]  %s647_s1, 4096, %s29_s20, [#allocation6], %s587_s22, %s587_s22, %s588_s23  }
  0x1a   :  { %577 = dma.done.wait [#allocation3], 4096  }
  0x1b   :  { %578 = vsyncadd [#allocation3], 4294963200 }
  0x1c   :  { %579 = dma.done.wait [#allocation6], 4096  }
  0x1d   :  { %580 = vsyncadd [#allocation6], 4294963200  ;;  %v142_v0 = vld [vmem:[#allocation5 + $0xf8] sm:$0xff]  ;;  %v141_v2 = vld [vmem:[#allocation5 + $0xf0] sm:$0xff] }
  0x1e   :  { %v126_v1 = vld [vmem:[#allocation5 + $0x78] sm:$0xff]  ;;  %397 = vmatprep.subr.mxu0 %v142_v0  ;;  %477 = vmatprep.subr.mxu1 %v142_v0  ;;  %v125_v3 = vld [vmem:[#allocation5 + $0x70] sm:$0xff]  ;;  %v140_v4 = vld [vmem:[#allocation5 + $0xe8] sm:$0xff] }
  0x1f   :  { %398 = vmatpush3.msra.mxu0 %v126_v1  ;;  %493 = vmatpush3.msra.mxu1 %v126_v1  ;;  %v124_v5 = vld [vmem:[#allocation5 + $0x68] sm:$0xff]  ;;  %v139_v6 = vld [vmem:[#allocation5 + $0xe0] sm:$0xff]  ;;  %v138_v8 = vld [vmem:[#allocation5 + $0xd8] sm:$0xff] }
  0x20   :  { %399 = vmatprep.subr.mxu0 %v141_v2  ;;  %478 = vmatprep.subr.mxu1 %v141_v2  ;;  %v123_v7 = vld [vmem:[#allocation5 + $0x60] sm:$0xff]  ;;  %v122_v9 = vld [vmem:[#allocation5 + $0x58] sm:$0xff]  ;;  %v137_v10 = vld [vmem:[#allocation5 + $0xd0] sm:$0xff] }
  0x21   :  { %400 = vmatpush3.msra.mxu0 %v125_v3  ;;  %494 = vmatpush3.msra.mxu1 %v125_v3  ;;  %v121_v11 = vld [vmem:[#allocation5 + $0x50] sm:$0xff]  ;;  %v136_v12 = vld [vmem:[#allocation5 + $0xc8] sm:$0xff]  ;;  %v135_v14 = vld [vmem:[#allocation5 + $0xc0] sm:$0xff] }
  0x22   :  { %401 = vmatprep.subr.mxu0 %v140_v4  ;;  %479 = vmatprep.subr.mxu1 %v140_v4  ;;  %v120_v13 = vld [vmem:[#allocation5 + $0x48] sm:$0xff]  ;;  %v119_v15 = vld [vmem:[#allocation5 + $0x40] sm:$0xff]  ;;  %v134_v16 = vld [vmem:[#allocation5 + $0xb8] sm:$0xff] }
  0x23   :  { %402 = vmatpush3.msra.mxu0 %v124_v5  ;;  %495 = vmatpush3.msra.mxu1 %v124_v5  ;;  %v118_v17 = vld [vmem:[#allocation5 + $0x38] sm:$0xff]  ;;  %v133_v18 = vld [vmem:[#allocation5 + $0xb0] sm:$0xff]  ;;  %v132_v20 = vld [vmem:[#allocation5 + $0xa8] sm:$0xff] }
  0x24   :  { %403 = vmatprep.subr.mxu0 %v139_v6  ;;  %480 = vmatprep.subr.mxu1 %v139_v6  ;;  %v117_v19 = vld [vmem:[#allocation5 + $0x30] sm:$0xff]  ;;  %v116_v21 = vld [vmem:[#allocation5 + $0x28] sm:$0xff]  ;;  %v131_v22 = vld [vmem:[#allocation5 + $0xa0] sm:$0xff] }
  0x25   :  { %404 = vmatpush3.msra.mxu0 %v123_v7  ;;  %496 = vmatpush3.msra.mxu1 %v123_v7  ;;  %v115_v23 = vld [vmem:[#allocation5 + $0x20] sm:$0xff]  ;;  %v130_v24 = vld [vmem:[#allocation5 + $0x98] sm:$0xff]  ;;  %v129_v26 = vld [vmem:[#allocation5 + $0x90] sm:$0xff] }
  0x26   :  { %405 = vmatprep.subr.mxu0 %v138_v8  ;;  %481 = vmatprep.subr.mxu1 %v138_v8  ;;  %v114_v25 = vld [vmem:[#allocation5 + $0x18] sm:$0xff]  ;;  %v113_v27 = vld [vmem:[#allocation5 + $0x10] sm:$0xff]  ;;  %v128_v28 = vld [vmem:[#allocation5 + $0x88] sm:$0xff] }
  0x27   :  { %406 = vmatpush3.msra.mxu0 %v122_v9  ;;  %497 = vmatpush3.msra.mxu1 %v122_v9  ;;  %v112_v29 = vld [vmem:[#allocation5 + $0x8] sm:$0xff]  ;;  %v127_v30 = vld [vmem:[#allocation5 + $0x80] sm:$0xff]  ;;  %v82_v36 = vld [vmem:[#allocation2 + $0x18] sm:$0xff] }
  0x28   :  { %407 = vmatprep.subr.mxu0 %v137_v10  ;;  %482 = vmatprep.subr.mxu1 %v137_v10  ;;  %v111_v31 = vld [vmem:[#allocation5] sm:$0xff]  ;;  %v80_v32 = vld [vmem:[#allocation2 + $0x8] sm:$0xff]  ;;  %v98_v37 = vld [vmem:[#allocation2 + $0x98] sm:$0xff] }
  0x29   :  { %408 = vmatpush3.msra.mxu0 %v121_v11  ;;  %498 = vmatpush3.msra.mxu1 %v121_v11  ;;  %v96_v33 = vld [vmem:[#allocation2 + $0x88] sm:$0xff]  ;;  %v79_v34 = vld [vmem:[#allocation2] sm:$0xff]  ;;  %v81_v38 = vld [vmem:[#allocation2 + $0x10] sm:$0xff] }
  0x2a   :  { %409 = vmatprep.subr.mxu0 %v136_v12  ;;  %483 = vmatprep.subr.mxu1 %v136_v12  ;;  %v95_v35 = vld [vmem:[#allocation2 + $0x80] sm:$0xff]  ;;  %v97_v39 = vld [vmem:[#allocation2 + $0x90] sm:$0xff]  ;;  %v84_v40 = vld [vmem:[#allocation2 + $0x28] sm:$0xff] }
  0x2b   :  { %410 = vmatpush3.msra.mxu0 %v120_v13  ;;  %499 = vmatpush3.msra.mxu1 %v120_v13  ;;  %v100_v41 = vld [vmem:[#allocation2 + $0xa8] sm:$0xff]  ;;  %v83_v42 = vld [vmem:[#allocation2 + $0x20] sm:$0xff]  ;;  %v86_v44 = vld [vmem:[#allocation2 + $0x38] sm:$0xff] }
  0x2c   :  { %411 = vmatprep.subr.mxu0 %v135_v14  ;;  %484 = vmatprep.subr.mxu1 %v135_v14  ;;  %v99_v43 = vld [vmem:[#allocation2 + $0xa0] sm:$0xff]  ;;  %v102_v45 = vld [vmem:[#allocation2 + $0xb8] sm:$0xff]  ;;  %v85_v46 = vld [vmem:[#allocation2 + $0x30] sm:$0xff] }
  0x2d   :  { %412 = vmatpush3.msra.mxu0 %v119_v15  ;;  %500 = vmatpush3.msra.mxu1 %v119_v15  ;;  %v101_v47 = vld [vmem:[#allocation2 + $0xb0] sm:$0xff]  ;;  %v88_v48 = vld [vmem:[#allocation2 + $0x48] sm:$0xff]  ;;  %v87_v50 = vld [vmem:[#allocation2 + $0x40] sm:$0xff] }
  0x2e   :  { %413 = vmatprep.subr.mxu0 %v134_v16  ;;  %485 = vmatprep.subr.mxu1 %v134_v16  ;;  %v104_v49 = vld [vmem:[#allocation2 + $0xc8] sm:$0xff]  ;;  %v103_v51 = vld [vmem:[#allocation2 + $0xc0] sm:$0xff]  ;;  %v90_v52 = vld [vmem:[#allocation2 + $0x58] sm:$0xff] }
  0x2f   :  { %414 = vmatpush3.msra.mxu0 %v118_v17  ;;  %501 = vmatpush3.msra.mxu1 %v118_v17  ;;  %v106_v53 = vld [vmem:[#allocation2 + $0xd8] sm:$0xff]  ;;  %v89_v54 = vld [vmem:[#allocation2 + $0x50] sm:$0xff]  ;;  %v92_v56 = vld [vmem:[#allocation2 + $0x68] sm:$0xff] }
  0x30   :  { %415 = vmatprep.subr.mxu0 %v133_v18  ;;  %486 = vmatprep.subr.mxu1 %v133_v18  ;;  %v105_v55 = vld [vmem:[#allocation2 + $0xd0] sm:$0xff]  ;;  %v108_v57 = vld [vmem:[#allocation2 + $0xe8] sm:$0xff]  ;;  %v91_v58 = vld [vmem:[#allocation2 + $0x60] sm:$0xff] }
  0x31   :  { %416 = vmatpush3.msra.mxu0 %v117_v19  ;;  %502 = vmatpush3.msra.mxu1 %v117_v19  ;;  %v107_v59 = vld [vmem:[#allocation2 + $0xe0] sm:$0xff]  ;;  %v94_v60 = vld [vmem:[#allocation2 + $0x78] sm:$0xff]  ;;  %v93_v62 = vld [vmem:[#allocation2 + $0x70] sm:$0xff] }
  0x32   :  { %417 = vmatprep.subr.mxu0 %v132_v20  ;;  %487 = vmatprep.subr.mxu1 %v132_v20  ;;  %v110_v61 = vld [vmem:[#allocation2 + $0xf8] sm:$0xff]  ;;  %v109_v63 = vld [vmem:[#allocation2 + $0xf0] sm:$0xff]  ;;  %v622_v6 = vld [vmem:[%s648_s2] ss:$0 sm:$0xff]  ;;  %s589_s2 = smov [#allocation7]  }
  0x33   :  { %418 = vmatpush3.msra.mxu0 %v116_v21  ;;  %503 = vmatpush3.msra.mxu1 %v116_v21  ;;  %s383_s26 = sshll.u32 %s589_s2, 4  ;;  %s384_s26 = int_to_ptr.vmem [resolvable:$true] %s383_s26 }
  0x34   :  { %419 = vmatprep.subr.mxu0 %v131_v22  ;;  %488 = vmatprep.subr.mxu1 %v131_v22  ;;  %s557_s27 = scalar_lea.vmem %s384_s26, 2048  ;;  %p562_p11 = scmp.lt.s32.totalorder %s384_s26, %s384_s26 }
  0x35   :  { %420 = vmatpush3.msra.mxu0 %v115_v23  ;;  %504 = vmatpush3.msra.mxu1 %v115_v23  ;;  %p558_p10 = scmp.ne.s32.totalorder %s384_s26, %s557_s27  ;;  %p563_p12 = scmp.lt.s32.totalorder %s557_s27, %s557_s27 }
  0x36   :  { %421 = vmatprep.subr.mxu0 %v130_v24  ;;  %489 = vmatprep.subr.mxu1 %v130_v24 }
  0x37   :  { %422 = vmatpush3.msra.mxu0 %v114_v25  ;;  %505 = vmatpush3.msra.mxu1 %v114_v25  ;;  %p564_p13 = por %p563_p12, %p562_p11 }
  0x38   :  { %423 = vmatprep.subr.mxu0 %v129_v26  ;;  %490 = vmatprep.subr.mxu1 %v129_v26 }
  0x39   :  { %424 = vmatpush3.msra.mxu0 %v113_v27  ;;  %506 = vmatpush3.msra.mxu1 %v113_v27  ;;  %p565_p0 = pnand %p564_p13, %p558_p10 }
  0x3a   :  { %425 = vmatprep.subr.mxu0 %v128_v28  ;;  %491 = vmatprep.subr.mxu1 %v128_v28 }
  0x3b   :  { %426 = vmatpush3.msra.mxu0 %v112_v29  ;;  %507 = vmatpush3.msra.mxu1 %v112_v29 }
  0x3c   :  { %427 = vmatprep.subr.mxu0 %v127_v30  ;;  %492 = vmatprep.subr.mxu1 %v127_v30 }
  0x3d   :  { %428 = vmatpush3.msra.mxu0 %v111_v31  ;;  %508 = vmatpush3.msra.mxu1 %v111_v31 }
  0x3e   :  { %207 = vmatprep.mubr.f32.mxu0 %v80_v32  ;;  %247 = vmatprep.mubr.f32.mxu1 %v96_v33 }
  0x3f   :  { %208 = vmatmul.mubr.f32.vlgmr.msra.gmra.mxu0 %v79_v34  ;;  %248 = vmatmul.mubr.f32.vlgmr.msra.gmra.mxu1 %v95_v35 }
  0x40   :  { %212 = vmatprep.mubr.f32.mxu0 %v82_v36  ;;  %252 = vmatprep.mubr.f32.mxu1 %v98_v37 }
  0x43   :  { %213 = vmatmul.mubr.f32.gmra.mxu0 %v81_v38  ;;  %253 = vmatmul.mubr.f32.gmra.mxu1 %v97_v39 }
  0x44   :  { %217 = vmatprep.mubr.f32.mxu0 %v84_v40  ;;  %257 = vmatprep.mubr.f32.mxu1 %v100_v41 }
  0x47   :  { %218 = vmatmul.mubr.f32.gmra.mxu0 %v83_v42  ;;  %258 = vmatmul.mubr.f32.gmra.mxu1 %v99_v43 }
  0x48   :  { %222 = vmatprep.mubr.f32.mxu0 %v86_v44  ;;  %262 = vmatprep.mubr.f32.mxu1 %v102_v45 }
  0x4b   :  { %223 = vmatmul.mubr.f32.gmra.mxu0 %v85_v46  ;;  %263 = vmatmul.mubr.f32.gmra.mxu1 %v101_v47 }
  0x4c   :  { %227 = vmatprep.mubr.f32.mxu0 %v88_v48  ;;  %267 = vmatprep.mubr.f32.mxu1 %v104_v49 }
  0x4f   :  { %228 = vmatmul.mubr.f32.gmra.mxu0 %v87_v50  ;;  %268 = vmatmul.mubr.f32.gmra.mxu1 %v103_v51 }
  0x50   :  { %232 = vmatprep.mubr.f32.mxu0 %v90_v52  ;;  %272 = vmatprep.mubr.f32.mxu1 %v106_v53 }
  0x53   :  { %233 = vmatmul.mubr.f32.gmra.mxu0 %v89_v54  ;;  %273 = vmatmul.mubr.f32.gmra.mxu1 %v105_v55 }
  0x54   :  { %237 = vmatprep.mubr.f32.mxu0 %v92_v56  ;;  %277 = vmatprep.mubr.f32.mxu1 %v108_v57 }
  0x57   :  { %238 = vmatmul.mubr.f32.gmra.mxu0 %v91_v58  ;;  %278 = vmatmul.mubr.f32.gmra.mxu1 %v107_v59 }
  0x58   :  { %242 = vmatprep.mubr.f32.mxu0 %v94_v60  ;;  %282 = vmatprep.mubr.f32.mxu1 %v110_v61 }
  0x5b   :  { %243 = vmatmul.mubr.f32.gmra.mxu0 %v93_v62  ;;  %283 = vmatmul.mubr.f32.gmra.mxu1 %v109_v63 }
  0xff   :  { %v429_v0 = vpop.f32.mrf.mxu0  ;;  %v453_v1 = vpop.f32.mrf.mxu1 }
 0x101   :  { %v430_v2 = vpop.f32.mrf.mxu0  ;;  %v454_v3 = vpop.f32.mrf.mxu1 }
 0x102   :  { %v431_v4 = vadd.f32 %v430_v2, %v429_v0  ;;  %v455_v5 = vadd.f32 %v454_v3, %v453_v1 }
 0x103   :  { %v432_v7 = vpop.f32.mrf.mxu0  ;;  %v456_v8 = vpop.f32.mrf.mxu1 }
 0x104   :  { %v346_v11 = vadd.f32 %v431_v4, %v622_v6  ;;  %v354_v12 = vadd.f32 %v455_v5, %v622_v6 }
 0x105   :  { %v433_v9 = vpop.f32.mrf.mxu0  ;;  %v457_v10 = vpop.f32.mrf.mxu1 }
 0x106   :  { %v434_v13 = vadd.f32 %v433_v9, %v432_v7  ;;  %v458_v14 = vadd.f32 %v457_v10, %v456_v8  ;;  %362 = vst [vmem:[#allocation7] sm:$0xff] %v346_v11  ;;  %370 = vst [vmem:[#allocation7 + $0x40] sm:$0xff] %v354_v12 }
 0x107   :  { %v435_v15 = vpop.f32.mrf.mxu0  ;;  %v459_v16 = vpop.f32.mrf.mxu1 }
 0x108   :  { %v347_v19 = vadd.f32 %v434_v13, %v622_v6  ;;  %v355_v20 = vadd.f32 %v458_v14, %v622_v6 }
 0x109   :  { %v436_v17 = vpop.f32.mrf.mxu0  ;;  %v460_v18 = vpop.f32.mrf.mxu1 }
 0x10a   :  { %v437_v21 = vadd.f32 %v436_v17, %v435_v15  ;;  %v461_v22 = vadd.f32 %v460_v18, %v459_v16  ;;  %363 = vst [vmem:[#allocation7 + $0x8] sm:$0xff] %v347_v19  ;;  %371 = vst [vmem:[#allocation7 + $0x48] sm:$0xff] %v355_v20 }
 0x10b   :  { %v438_v23 = vpop.f32.mrf.mxu0  ;;  %v462_v24 = vpop.f32.mrf.mxu1 }
 0x10c   :  { %v348_v27 = vadd.f32 %v437_v21, %v622_v6  ;;  %v356_v28 = vadd.f32 %v461_v22, %v622_v6 }
 0x10d   :  { %v439_v25 = vpop.f32.mrf.mxu0  ;;  %v463_v26 = vpop.f32.mrf.mxu1 }
 0x10e   :  { %v440_v29 = vadd.f32 %v439_v25, %v438_v23  ;;  %v464_v30 = vadd.f32 %v463_v26, %v462_v24  ;;  %364 = vst [vmem:[#allocation7 + $0x10] sm:$0xff] %v348_v27  ;;  %372 = vst [vmem:[#allocation7 + $0x50] sm:$0xff] %v356_v28 }
 0x10f   :  { %v441_v31 = vpop.f32.mrf.mxu0  ;;  %v465_v32 = vpop.f32.mrf.mxu1 }
 0x110   :  { %v349_v35 = vadd.f32 %v440_v29, %v622_v6  ;;  %v357_v36 = vadd.f32 %v464_v30, %v622_v6 }
 0x111   :  { %v442_v33 = vpop.f32.mrf.mxu0  ;;  %v466_v34 = vpop.f32.mrf.mxu1 }
 0x112   :  { %v443_v37 = vadd.f32 %v442_v33, %v441_v31  ;;  %v467_v38 = vadd.f32 %v466_v34, %v465_v32  ;;  %365 = vst [vmem:[#allocation7 + $0x18] sm:$0xff] %v349_v35  ;;  %373 = vst [vmem:[#allocation7 + $0x58] sm:$0xff] %v357_v36 }
 0x113   :  { %v444_v39 = vpop.f32.mrf.mxu0  ;;  %v468_v40 = vpop.f32.mrf.mxu1 }
 0x114   :  { %v350_v43 = vadd.f32 %v443_v37, %v622_v6  ;;  %v358_v44 = vadd.f32 %v467_v38, %v622_v6 }
 0x115   :  { %v445_v41 = vpop.f32.mrf.mxu0  ;;  %v469_v42 = vpop.f32.mrf.mxu1 }
 0x116   :  { %v446_v45 = vadd.f32 %v445_v41, %v444_v39  ;;  %v470_v46 = vadd.f32 %v469_v42, %v468_v40  ;;  %366 = vst [vmem:[#allocation7 + $0x20] sm:$0xff] %v350_v43  ;;  %374 = vst [vmem:[#allocation7 + $0x60] sm:$0xff] %v358_v44 }
 0x117   :  { %v447_v47 = vpop.f32.mrf.mxu0  ;;  %v471_v48 = vpop.f32.mrf.mxu1 }
 0x118   :  { %v351_v51 = vadd.f32 %v446_v45, %v622_v6  ;;  %v359_v52 = vadd.f32 %v470_v46, %v622_v6 }
 0x119   :  { %v448_v49 = vpop.f32.mrf.mxu0  ;;  %v472_v50 = vpop.f32.mrf.mxu1 }
 0x11a   :  { %v449_v53 = vadd.f32 %v448_v49, %v447_v47  ;;  %v473_v54 = vadd.f32 %v472_v50, %v471_v48  ;;  %367 = vst [vmem:[#allocation7 + $0x28] sm:$0xff] %v351_v51  ;;  %375 = vst [vmem:[#allocation7 + $0x68] sm:$0xff] %v359_v52 }
 0x11b   :  { %v450_v55 = vpop.f32.mrf.mxu0  ;;  %v474_v56 = vpop.f32.mrf.mxu1 }
 0x11c   :  { %v352_v59 = vadd.f32 %v449_v53, %v622_v6  ;;  %v360_v60 = vadd.f32 %v473_v54, %v622_v6 }
 0x11d   :  { %v451_v57 = vpop.f32.mrf.mxu0  ;;  %v475_v58 = vpop.f32.mrf.mxu1 }
 0x11e   :  { %v452_v61 = vadd.f32 %v451_v57, %v450_v55  ;;  %v476_v62 = vadd.f32 %v475_v58, %v474_v56  ;;  %368 = vst [vmem:[#allocation7 + $0x30] sm:$0xff] %v352_v59  ;;  %376 = vst [vmem:[#allocation7 + $0x70] sm:$0xff] %v360_v60 }
 0x120   :  { %v353_v63 = vadd.f32 %v452_v61, %v622_v6  ;;  %v361_v0 = vadd.f32 %v476_v62, %v622_v6 }
 0x122   :  { %369 = vst [vmem:[#allocation7 + $0x38] sm:$0xff] %v353_v63  ;;  %377 = vst [vmem:[#allocation7 + $0x78] sm:$0xff] %v361_v0 }
 0x123   :  { %568 = shalt.err (!%p565_p0)
}
 0x124   :  { %389 = dma.vmem_to_hbm [thread:$0]  %s384_s26, 2048, %s649_s3, [#allocation4], %s587_s22, %s587_s22, %s588_s23  }
 0x125   :  { %581 = dma.done.wait [#allocation4], 2048  }
 0x126   :  { %582 = vsyncadd [#allocation4], 4294965248 }
 0x127   :  { %393 = vsyncpa [#allocation3], 1 }
 0x128   :  { %394 = vsyncpa [#allocation6], 1 }
 0x129   :  { %395 = vsyncpa [#allocation4], 1 }

</bundles_post_ra>
